<compile_context>
chip_gen: v6e
topology: v6e:2x2x1
jax: 0.10.0
libtpu: 0.0.40
codegen_flags: <defaults>
</compile_context>

<pallas_src>
import functools

import jax
import jax.numpy as jnp
from jax.experimental import pallas as pl
from jax.experimental.pallas import tpu as pltpu

LANE = 128      # padded hidden feature dim (lane width)
OUT_DIM = 42    # true output features
OUT_LANE = 64   # padded output features (64 == full array dim -> legal block)
IN_DIM = 10


def _round_up(n, m):
    return (n + m - 1) // m * m


def _pad2d(a, rows, cols):
    return jnp.pad(a, ((0, rows - a.shape[0]), (0, cols - a.shape[1])))


def mlp_kernel(x_ref,
               w1_ref, b1_ref,
               w2_ref, b2_ref,
               w3_ref, b3_ref,
               w4_ref, b4_ref,
               o_ref):
    """Fused forward: 4 bf16 MXU matmuls with f32 accumulation, bias, ReLU.

    Bias-add / ReLU stay in f32 (v5e has no bf16 VPU); activations are cast to
    bf16 only immediately before each dot. The f32 accumulator is cast to the
    output dtype only at the final store.
    """
    x = x_ref[...].astype(w1_ref.dtype)                 # in-kernel f32 -> bf16 cast

    h = jnp.dot(x, w1_ref[...], preferred_element_type=jnp.float32) + b1_ref[...]
    h = jnp.maximum(h, 0.0).astype(w2_ref.dtype)        # (TM, 128)

    h = jnp.dot(h, w2_ref[...], preferred_element_type=jnp.float32) + b2_ref[...]
    h = jnp.maximum(h, 0.0).astype(w3_ref.dtype)

    h = jnp.dot(h, w3_ref[...], preferred_element_type=jnp.float32) + b3_ref[...]
    h = jnp.maximum(h, 0.0).astype(w4_ref.dtype)

    h = jnp.dot(h, w4_ref[...], preferred_element_type=jnp.float32) + b4_ref[...]

    o_ref[...] = h.astype(o_ref.dtype)                  # (TM, 64) bf16 store


def prepare_params(params, *, compute_dtype=jnp.bfloat16):
    """Pad + cast the weights/biases ONCE (outside the per-call hot path).

    Zero padding keeps the math exact: padded weight rows are 0, padded bias
    columns are 0, and ReLU preserves zeros, so padded lanes stay 0 everywhere.
    Weights are (in_features, out_features); kernel computes x @ W + b.
    """
    w1p = _pad2d(params["w1"], IN_DIM, LANE).astype(compute_dtype)
    w2p = _pad2d(params["w2"], LANE, LANE).astype(compute_dtype)
    w3p = _pad2d(params["w3"], LANE, LANE).astype(compute_dtype)
    w4p = _pad2d(params["w4"], LANE, OUT_LANE).astype(compute_dtype)
    b1p = _pad2d(params["b1"], 1, LANE).astype(jnp.float32)
    b2p = _pad2d(params["b2"], 1, LANE).astype(jnp.float32)
    b3p = _pad2d(params["b3"], 1, LANE).astype(jnp.float32)
    b4p = _pad2d(params["b4"], 1, OUT_LANE).astype(jnp.float32)
    return (w1p, b1p, w2p, b2p, w3p, b3p, w4p, b4p)


def _choose_tile(B, tm_max):
    """Pick the batch tile.

    Big tiles amortize the ~0.35 us per-grid-step overhead, but we cap the tile
    at ~B/2 (rounded up to 16) so that, when B is large enough, there are at
    least two balanced grid steps and v7x's two TensorCores can both work the
    "parallel" batch axis.
    """
    half = _round_up(-(-max(B, 1) // 2), 16)
    tm = max(16, min(tm_max, half))
    b_pad = _round_up(max(B, 1), tm)
    return tm, b_pad


def mynetwork1_forward(x, prepared, *, tm=2048, out_dtype=jnp.bfloat16,
                       return_padded=False):
    """x: (B, 10) float32. prepared: tuple from prepare_params().

    If return_padded=True the raw (b_pad, 64) kernel output is returned and the
    post-kernel slice pass is skipped entirely.
    """
    B, in_dim = x.shape
    assert in_dim == IN_DIM

    tm, b_pad = _choose_tile(B, tm)
    grid_m = b_pad // tm

    # Zero-pad batch rows to a tile multiple (no-op copy when already aligned);
    # x stays f32 — the bf16 cast happens inside the kernel.
    xp = x if b_pad == B else jnp.pad(x, ((0, b_pad - B), (0, 0)))

    args = (xp,) + tuple(prepared)

    in_specs = [pl.BlockSpec((tm, IN_DIM), lambda i: (i, 0))]        # activations: tiled
    for a in prepared:                                               # params: VMEM-resident
        in_specs.append(
            pl.BlockSpec(a.shape, lambda i, _nd=a.ndim: (0,) * _nd))

    out_specs = pl.BlockSpec((tm, OUT_LANE), lambda i: (i, 0))

    param_bytes = sum(int(a.size) * a.dtype.itemsize for a in prepared)
    cost = pl.CostEstimate(
        flops=2 * b_pad * (IN_DIM * LANE + 2 * LANE * LANE + LANE * OUT_LANE),
        transcendentals=0,
        bytes_accessed=int(xp.size) * xp.dtype.itemsize
        + param_bytes
        + b_pad * OUT_LANE * jnp.dtype(out_dtype).itemsize,
    )

    out = pl.pallas_call(
        mlp_kernel,
        out_shape=jax.ShapeDtypeStruct((b_pad, OUT_LANE), out_dtype),
        grid=(grid_m,),
        in_specs=in_specs,
        out_specs=out_specs,
        compiler_params=pltpu.CompilerParams(
            dimension_semantics=("parallel",),      # 2x on v7x, no-op on v5e/v6e
        ),
        cost_estimate=cost,
    )(*args)

    if return_padded:
        return out
    return out[:B, :OUT_DIM]


def init_params(key):
    """Mirror PyTorch nn.Linear default init: U[-1/sqrt(fan_in), +1/sqrt(fan_in)]."""
    dims = [(10, 32), (32, 64), (64, 32), (32, 42)]
    params = {}
    keys = jax.random.split(key, 2 * len(dims))
    for i, (fan_in, fan_out) in enumerate(dims):
        bound = 1.0 / jnp.sqrt(float(fan_in))
        params[f"w{i + 1}"] = jax.random.uniform(
            keys[2 * i], (fan_in, fan_out), minval=-bound, maxval=bound,
            dtype=jnp.float32)
        params[f"b{i + 1}"] = jax.random.uniform(
            keys[2 * i + 1], (1, fan_out), minval=-bound, maxval=bound,
            dtype=jnp.float32)
    return params


def reference_forward_f32(x, params):
    """Pure f32 reference (original PyTorch module semantics)."""
    h = jnp.maximum(x @ params["w1"] + params["b1"], 0.0)
    h = jnp.maximum(h @ params["w2"] + params["b2"], 0.0)
    h = jnp.maximum(h @ params["w3"] + params["b3"], 0.0)
    return h @ params["w4"] + params["b4"]


def reference_forward_bf16(x, params):
    """Reference mirroring kernel numerics: bf16 operands, f32 accumulate."""
    def c(v):
        return v.astype(jnp.bfloat16).astype(jnp.float32)
    h = jnp.maximum(c(x) @ c(params["w1"]) + params["b1"], 0.0)
    h = jnp.maximum(c(h) @ c(params["w2"]) + params["b2"], 0.0)
    h = jnp.maximum(c(h) @ c(params["w3"]) + params["b3"], 0.0)
    return c(h) @ c(params["w4"]) + params["b4"]


if __name__ == "__main__":
    key = jax.random.PRNGKey(0)
    k_params, k_x1, k_x2 = jax.random.split(key, 3)
    params = init_params(k_params)
    prepared = prepare_params(params)           # pad + cast weights/biases once

    fwd = jax.jit(functools.partial(mynetwork1_forward, tm=2048))

    # Case 1: tiny batch (single tile path).
    B1 = 8
    x1 = jax.random.normal(k_x1, (B1, 10), dtype=jnp.float32)
    out1 = jax.block_until_ready(fwd(x1, prepared)).astype(jnp.float32)
    assert out1.shape == (B1, 42)
    assert jnp.allclose(out1, reference_forward_bf16(x1, params), atol=2e-2, rtol=2e-2)
    assert jnp.allclose(out1, reference_forward_f32(x1, params), atol=1e-1, rtol=5e-2)

    # Case 2: exercises the 2-step grid (tile chooser caps tm at ~B/2) and the
    # batch row-padding path (300 -> 320 rows at tm=160).
    B2 = 300
    x2 = jax.random.normal(k_x2, (B2, 10), dtype=jnp.float32)
    out2 = jax.block_until_ready(fwd(x2, prepared)).astype(jnp.float32)
    assert out2.shape == (B2, 42)
    assert jnp.allclose(out2, reference_forward_bf16(x2, params), atol=2e-2, rtol=2e-2)
    assert jnp.allclose(out2, reference_forward_f32(x2, params), atol=1e-1, rtol=5e-2)

    print("KERNEL_OK")
</pallas_src>

<mosaic_0001>
module attributes {stable_mosaic.version = 11 : i64} {
  func.func @mlp_kernel(%arg0: i32, %arg1: memref<16x10xf32, #tpu.memory_space<vmem>>, %arg2: memref<10x128xbf16, #tpu.memory_space<vmem>>, %arg3: memref<1x128xf32, #tpu.memory_space<vmem>>, %arg4: memref<128x128xbf16, #tpu.memory_space<vmem>>, %arg5: memref<1x128xf32, #tpu.memory_space<vmem>>, %arg6: memref<128x128xbf16, #tpu.memory_space<vmem>>, %arg7: memref<1x128xf32, #tpu.memory_space<vmem>>, %arg8: memref<128x64xbf16, #tpu.memory_space<vmem>>, %arg9: memref<1x64xf32, #tpu.memory_space<vmem>>, %arg10: memref<16x64xbf16, #tpu.memory_space<vmem>>) attributes {dimension_semantics = [#tpu.dimension_semantics<parallel>], iteration_bounds = array<i64: 1>, scalar_prefetch = 0 : i64, scratch_operands = 0 : i64, tpu.core_type = #tpu.core_type<tc>, window_params = [{transform_indices = @transform_0, window_bounds = array<i64: 16, 10>}, {pipeline_mode = #tpu.pipeline_mode<synchronous>, transform_indices = @transform_1, window_bounds = array<i64: 10, 128>}, {pipeline_mode = #tpu.pipeline_mode<synchronous>, transform_indices = @transform_2, window_bounds = array<i64: 1, 128>}, {pipeline_mode = #tpu.pipeline_mode<synchronous>, transform_indices = @transform_3, window_bounds = array<i64: 128, 128>}, {pipeline_mode = #tpu.pipeline_mode<synchronous>, transform_indices = @transform_4, window_bounds = array<i64: 1, 128>}, {pipeline_mode = #tpu.pipeline_mode<synchronous>, transform_indices = @transform_5, window_bounds = array<i64: 128, 128>}, {pipeline_mode = #tpu.pipeline_mode<synchronous>, transform_indices = @transform_6, window_bounds = array<i64: 1, 128>}, {pipeline_mode = #tpu.pipeline_mode<synchronous>, transform_indices = @transform_7, window_bounds = array<i64: 128, 64>}, {pipeline_mode = #tpu.pipeline_mode<synchronous>, transform_indices = @transform_8, window_bounds = array<i64: 1, 64>}, {transform_indices = @transform_9, window_bounds = array<i64: 16, 64>}]} {
    %c0 = arith.constant 0 : index
    %c0_0 = arith.constant 0 : index
    %0 = vector.load %arg1[%c0, %c0_0] : memref<16x10xf32, #tpu.memory_space<vmem>>, vector<16x10xf32>
    %1 = arith.truncf %0 : vector<16x10xf32> to vector<16x10xbf16>
    %c0_1 = arith.constant 0 : index
    %c0_2 = arith.constant 0 : index
    %2 = vector.load %arg2[%c0_1, %c0_2] : memref<10x128xbf16, #tpu.memory_space<vmem>>, vector<10x128xbf16>
    %cst = arith.constant dense<0.000000e+00> : vector<16x128xf32>
    %3 = tpu.matmul %1, %2, %cst {dimension_numbers = #tpu.dot_dimension_numbers<[1], [0], [0], [1], [0, 0, 1, 1], [], []>} : vector<16x10xbf16>, vector<10x128xbf16>, vector<16x128xf32> -> vector<16x128xf32>
    %c0_3 = arith.constant 0 : index
    %c0_4 = arith.constant 0 : index
    %4 = vector.load %arg3[%c0_3, %c0_4] : memref<1x128xf32, #tpu.memory_space<vmem>>, vector<1x128xf32>
    %5 = vector.broadcast %4 : vector<1x128xf32> to vector<16x128xf32>
    %6 = arith.addf %3, %5 : vector<16x128xf32>
    %cst_5 = arith.constant 0.000000e+00 : f32
    %7 = vector.broadcast %cst_5 : f32 to vector<16x128xf32>
    %8 = arith.maximumf %6, %7 : vector<16x128xf32>
    %9 = arith.truncf %8 : vector<16x128xf32> to vector<16x128xbf16>
    %c0_6 = arith.constant 0 : index
    %c0_7 = arith.constant 0 : index
    %10 = vector.load %arg4[%c0_6, %c0_7] : memref<128x128xbf16, #tpu.memory_space<vmem>>, vector<128x128xbf16>
    %cst_8 = arith.constant dense<0.000000e+00> : vector<16x128xf32>
    %11 = tpu.matmul %9, %10, %cst_8 {dimension_numbers = #tpu.dot_dimension_numbers<[1], [0], [0], [1], [0, 0, 1, 1], [], []>} : vector<16x128xbf16>, vector<128x128xbf16>, vector<16x128xf32> -> vector<16x128xf32>
    %c0_9 = arith.constant 0 : index
    %c0_10 = arith.constant 0 : index
    %12 = vector.load %arg5[%c0_9, %c0_10] : memref<1x128xf32, #tpu.memory_space<vmem>>, vector<1x128xf32>
    %13 = vector.broadcast %12 : vector<1x128xf32> to vector<16x128xf32>
    %14 = arith.addf %11, %13 : vector<16x128xf32>
    %cst_11 = arith.constant 0.000000e+00 : f32
    %15 = vector.broadcast %cst_11 : f32 to vector<16x128xf32>
    %16 = arith.maximumf %14, %15 : vector<16x128xf32>
    %17 = arith.truncf %16 : vector<16x128xf32> to vector<16x128xbf16>
    %c0_12 = arith.constant 0 : index
    %c0_13 = arith.constant 0 : index
    %18 = vector.load %arg6[%c0_12, %c0_13] : memref<128x128xbf16, #tpu.memory_space<vmem>>, vector<128x128xbf16>
    %cst_14 = arith.constant dense<0.000000e+00> : vector<16x128xf32>
    %19 = tpu.matmul %17, %18, %cst_14 {dimension_numbers = #tpu.dot_dimension_numbers<[1], [0], [0], [1], [0, 0, 1, 1], [], []>} : vector<16x128xbf16>, vector<128x128xbf16>, vector<16x128xf32> -> vector<16x128xf32>
    %c0_15 = arith.constant 0 : index
    %c0_16 = arith.constant 0 : index
    %20 = vector.load %arg7[%c0_15, %c0_16] : memref<1x128xf32, #tpu.memory_space<vmem>>, vector<1x128xf32>
    %21 = vector.broadcast %20 : vector<1x128xf32> to vector<16x128xf32>
    %22 = arith.addf %19, %21 : vector<16x128xf32>
    %cst_17 = arith.constant 0.000000e+00 : f32
    %23 = vector.broadcast %cst_17 : f32 to vector<16x128xf32>
    %24 = arith.maximumf %22, %23 : vector<16x128xf32>
    %25 = arith.truncf %24 : vector<16x128xf32> to vector<16x128xbf16>
    %c0_18 = arith.constant 0 : index
    %c0_19 = arith.constant 0 : index
    %26 = vector.load %arg8[%c0_18, %c0_19] : memref<128x64xbf16, #tpu.memory_space<vmem>>, vector<128x64xbf16>
    %cst_20 = arith.constant dense<0.000000e+00> : vector<16x64xf32>
    %27 = tpu.matmul %25, %26, %cst_20 {dimension_numbers = #tpu.dot_dimension_numbers<[1], [0], [0], [1], [0, 0, 1, 1], [], []>} : vector<16x128xbf16>, vector<128x64xbf16>, vector<16x64xf32> -> vector<16x64xf32>
    %c0_21 = arith.constant 0 : index
    %c0_22 = arith.constant 0 : index
    %28 = vector.load %arg9[%c0_21, %c0_22] : memref<1x64xf32, #tpu.memory_space<vmem>>, vector<1x64xf32>
    %29 = vector.broadcast %28 : vector<1x64xf32> to vector<16x64xf32>
    %30 = arith.addf %27, %29 : vector<16x64xf32>
    %31 = arith.truncf %30 : vector<16x64xf32> to vector<16x64xbf16>
    %c0_23 = arith.constant 0 : index
    %c0_24 = arith.constant 0 : index
    %32 = vector.load %arg10[%c0_23, %c0_24] : memref<16x64xbf16, #tpu.memory_space<vmem>>, vector<16x64xbf16>
    tpu.vector_store %arg10[%c0_23, %c0_24], %31 {strides = array<i32>} : memref<16x64xbf16, #tpu.memory_space<vmem>>, vector<16x64xbf16>,
    return
  }
  func.func @transform_0(%arg0: i32) -> (i32, i32) {
    %c0_i32 = arith.constant 0 : i32
    %c0_i32_0 = arith.constant 0 : i32
    return %arg0, %c0_i32 : i32, i32
  }
  func.func @transform_1(%arg0: i32) -> (i32, i32) {
    %c0_i32 = arith.constant 0 : i32
    %c0_i32_0 = arith.constant 0 : i32
    %c0_i32_1 = arith.constant 0 : i32
    return %c0_i32, %c0_i32_0 : i32, i32
  }
  func.func @transform_2(%arg0: i32) -> (i32, i32) {
    %c0_i32 = arith.constant 0 : i32
    %c0_i32_0 = arith.constant 0 : i32
    %c0_i32_1 = arith.constant 0 : i32
    return %c0_i32, %c0_i32_0 : i32, i32
  }
  func.func @transform_3(%arg0: i32) -> (i32, i32) {
    %c0_i32 = arith.constant 0 : i32
    %c0_i32_0 = arith.constant 0 : i32
    %c0_i32_1 = arith.constant 0 : i32
    return %c0_i32, %c0_i32_0 : i32, i32
  }
  func.func @transform_4(%arg0: i32) -> (i32, i32) {
    %c0_i32 = arith.constant 0 : i32
    %c0_i32_0 = arith.constant 0 : i32
    %c0_i32_1 = arith.constant 0 : i32
    return %c0_i32, %c0_i32_0 : i32, i32
  }
  func.func @transform_5(%arg0: i32) -> (i32, i32) {
    %c0_i32 = arith.constant 0 : i32
    %c0_i32_0 = arith.constant 0 : i32
    %c0_i32_1 = arith.constant 0 : i32
    return %c0_i32, %c0_i32_0 : i32, i32
  }
  func.func @transform_6(%arg0: i32) -> (i32, i32) {
    %c0_i32 = arith.constant 0 : i32
    %c0_i32_0 = arith.constant 0 : i32
    %c0_i32_1 = arith.constant 0 : i32
    return %c0_i32, %c0_i32_0 : i32, i32
  }
  func.func @transform_7(%arg0: i32) -> (i32, i32) {
    %c0_i32 = arith.constant 0 : i32
    %c0_i32_0 = arith.constant 0 : i32
    %c0_i32_1 = arith.constant 0 : i32
    return %c0_i32, %c0_i32_0 : i32, i32
  }
  func.func @transform_8(%arg0: i32) -> (i32, i32) {
    %c0_i32 = arith.constant 0 : i32
    %c0_i32_0 = arith.constant 0 : i32
    %c0_i32_1 = arith.constant 0 : i32
    return %c0_i32, %c0_i32_0 : i32, i32
  }
  func.func @transform_9(%arg0: i32) -> (i32, i32) {
    %c0_i32 = arith.constant 0 : i32
    %c0_i32_0 = arith.constant 0 : i32
    return %arg0, %c0_i32 : i32, i32
  }
}

</mosaic_0001>

<bundles_post_ra>
// kernel: mynetwork1_forward.1
= control target key start
LH: loop header
LB: loop body
LE: loop exit
PB: predicated region body
PF: predicated region fallthrough
CT: control target
= control target key end

     0   :  { %14 = vsyncpa [#allocation3], 0  ;;  %s912_s0 = inlined_call_operand.vmem [shape: f32[16,10], index: 0, kind: input, shape index: {}]   ;;  %s913_s1 = inlined_call_operand.hbm [shape: bf16[10,128], index: 1, kind: input, shape index: {}]   ;;  %s914_s2 = inlined_call_operand.hbm [shape: f32[1,128], index: 2, kind: input, shape index: {}]   ;;  %s915_s3 = inlined_call_operand.vmem [shape: bf16[128,128], index: 3, kind: input, shape index: {}]   ;;  %s916_s4 = inlined_call_operand.hbm [shape: f32[1,128], index: 4, kind: input, shape index: {}]   ;;  %s917_s5 = inlined_call_operand.vmem [shape: bf16[128,128], index: 5, kind: input, shape index: {}]   ;;  %s918_s6 = inlined_call_operand.vmem [shape: f32[1,128], index: 6, kind: input, shape index: {}]   ;;  %s919_s7 = inlined_call_operand.vmem [shape: bf16[128,64], index: 7, kind: input, shape index: {}]   ;;  %s920_s8 = inlined_call_operand.vmem [shape: f32[1,64], index: 8, kind: input, shape index: {}]   ;;  %s921_s9 = inlined_call_operand.vmem [shape: bf16[16,64], index: 9, kind: output, shape index: {}]  }
   0x1   :  { %15 = vsyncpa [#allocation5], 0  ;;  %s723_s30 = smov [#allocation4]   ;;  %s724_s11 = smov [#allocation2]  }
   0x2   :  { %s36_s10 = sshll.u32 %s723_s30, 4  ;;  %s23_s12 = sshll.u32 %s724_s11, 4  ;;  %s37_s10 = int_to_ptr.vmem [resolvable:$true] %s36_s10  ;;  %s24_s12 = int_to_ptr.vmem [resolvable:$true] %s23_s12 }
   0x3   :  { %s667_s13 = scalar_lea.vmem %s37_s10, 16  ;;  %s671_s14 = scalar_lea.vmem %s37_s10, 32 }
   0x4   :  { %p668_p0 = scmp.ne.s32.totalorder %s37_s10, %s667_s13  ;;  %p672_p1 = scmp.lt.s32.totalorder %s37_s10, %s37_s10 }
   0x5   :  { %p673_p2 = scmp.lt.s32.totalorder %s671_s14, %s667_s13 }
   0x7   :  { %p674_p3 = por %p673_p2, %p672_p1 }
   0x9   :  { %p675_p4 = pnand %p674_p3, %p668_p0 }
   0xb   :  { %678 = shalt.err (!%p675_p4)
}
   0xc   :  { %39 = dma.hbm_to_vmem [thread:$0]  %s914_s2, 16, %s37_s10, [#allocation5]  }
   0xd   :  { %s687_s17 = scalar_lea.vmem %s24_s12, 128  ;;  %p692_p6 = scmp.lt.s32.totalorder %s24_s12, %s24_s12 }
   0xe   :  { %p688_p5 = scmp.ne.s32.totalorder %s24_s12, %s687_s17  ;;  %p693_p7 = scmp.lt.s32.totalorder %s687_s17, %s687_s17 }
  0x10   :  { %p694_p8 = por %p693_p7, %p692_p6 }
  0x12   :  { %p695_p9 = pnand %p694_p8, %p688_p5 }
  0x14   :  { %698 = shalt.err (!%p695_p9)
}
  0x15   :  { %s725_s18 = smov 64   ;;  %s726_s19 = smov 4  }
  0x16   :  { %29 = dma.hbm_to_vmem [thread:$0]  %s913_s1, 128, %s24_s12, [#allocation3], %s725_s18, %s725_s18, %s726_s19  }
  0x17   :  { %s727_s22 = smov [#allocation6]  }
  0x18   :  { %s48_s23 = sshll.u32 %s727_s22, 4  ;;  %s49_s23 = int_to_ptr.vmem [resolvable:$true] %s48_s23 }
  0x19   :  { %s707_s24 = scalar_lea.vmem %s49_s23, 16  ;;  %s711_s25 = scalar_lea.vmem %s49_s23, 32 }
  0x1a   :  { %p708_p10 = scmp.ne.s32.totalorder %s49_s23, %s707_s24  ;;  %p712_p11 = scmp.lt.s32.totalorder %s49_s23, %s49_s23 }
  0x1b   :  { %p713_p12 = scmp.lt.s32.totalorder %s711_s25, %s707_s24 }
  0x1d   :  { %p714_p13 = por %p713_p12, %p712_p11 }
  0x1f   :  { %p715_p0 = pnand %p714_p13, %p708_p10 }
  0x21   :  { %718 = shalt.err (!%p715_p0)
}
  0x22   :  { %51 = dma.hbm_to_vmem [thread:$0]  %s916_s4, 16, %s49_s23, [#allocation5]  }
  0x23   :  { %719 = dma.done.wait [#allocation3], 128  }
  0x24   :  { %720 = vsyncadd [#allocation3], 4294967168 }
  0x25   :  { %721 = dma.done.wait [#allocation5], 32  }
  0x26   :  { %722 = vsyncadd [#allocation5], 4294967264  ;;  %v728_v0 = vmov 0.0   ;;  %vm729_vm0 = vmmov 0   ;;  %vm91_vm1 = vcmask 1044480   ;;  %v70_v2 = vld [vmem:[%s912_s0] sm:$0xff] }
  0x27   :  { %561 = vmatprep.subr.bf16.mxu0 %v728_v0  ;;  %563 = vmatprep.mubr.msk.bf16.mxu0 %vm729_vm0, %v728_v0  ;;  %v634_v1 = vld [vmem:[#allocation2] sm:$0x1f]   ;;  %v71_v3 = vld [vmem:[%s912_s0 + $0x8] sm:$0xff]  ;;  %v635_v6 = vld [vmem:[%s915_s3 + $0x38] sm:$0xff]   ;;  %vm87_vm2 = vcmask 80896   ;;  %vm489_vm3 = vcmask 519168  }
  0x28   :  { %567 = vmatprep.subr.bf16.mxu1 %v728_v0  ;;  %583 = vmatprep.mubr.msk.bf16.mxu1 %vm729_vm0, %v728_v0  ;;  %v93_v4 = vsel %vm91_vm1, %v634_v1, 0  ;;  %v72_v5 = vpack.c.bf16 %v71_v3, %v70_v2  ;;  %v636_v7 = vld [vmem:[%s915_s3 + $0x30] sm:$0xff]   ;;  %v637_v8 = vld [vmem:[%s915_s3 + $0x28] sm:$0xff]   ;;  %v638_v9 = vld [vmem:[%s915_s3 + $0x20] sm:$0xff]  }
  0x29   :  { %562 = vmatpush3.bf16.msra.mxu0 %v93_v4  ;;  %568 = vmatpush3.bf16.msra.mxu1 %v635_v6  ;;  %v639_v10 = vld [vmem:[%s915_s3 + $0x18] sm:$0xff]   ;;  %v640_v11 = vld [vmem:[%s915_s3 + $0x10] sm:$0xff]   ;;  %v641_v12 = vld [vmem:[%s915_s3 + $0x8] sm:$0xff]  }
  0x2a   :  { %587 = vmatprep.subr.bf16.mxu0 %v728_v0  ;;  %569 = vmatprep.subr.bf16.mxu1 %v728_v0  ;;  %v642_v13 = vld [vmem:[%s915_s3] sm:$0xff]   ;;  %v643_v14 = vld [vmem:[%s917_s5 + $0x38] sm:$0xff]   ;;  %v644_v15 = vld [vmem:[%s917_s5 + $0x30] sm:$0xff]  }
  0x2b   :  { %v645_v16 = vld [vmem:[%s917_s5 + $0x28] sm:$0xff]   ;;  %v646_v17 = vld [vmem:[%s917_s5 + $0x20] sm:$0xff]   ;;  %v647_v18 = vld [vmem:[%s917_s5 + $0x18] sm:$0xff]  }
  0x2c   :  { %564 = vmatmul.mubr.msk.bf16.vlgmr.msra.gmra.mxu0 %vm87_vm2, %v72_v5  ;;  %v498_v19 = vld [vmem:[#allocation4] ss:$0 sm:$0xff]  ;;  %v648_v29 = vld [vmem:[%s917_s5 + $0x10] sm:$0xff]   ;;  %v650_v31 = vld [vmem:[%s917_s5] sm:$0xff]  }
  0x2d   :  { %603 = vmatprep.mubr.msk.bf16.mxu0 %vm729_vm0, %v728_v0  ;;  %570 = vmatpush3.bf16.msra.mxu1 %v636_v7  ;;  %v649_v30 = vld [vmem:[%s917_s5 + $0x8] sm:$0xff]   ;;  %v651_v32 = vld [vmem:[%s919_s7 + $0x38] sm:$0xff]   ;;  %v652_v33 = vld [vmem:[%s919_s7 + $0x30] sm:$0xff]  }
  0x2e   :  { %571 = vmatprep.subr.bf16.mxu1 %v728_v0  ;;  %588 = vmatpush3.bf16.msra.mxu0 %v643_v14  ;;  %v653_v34 = vld [vmem:[%s919_s7 + $0x28] sm:$0xff]   ;;  %v654_v35 = vld [vmem:[%s919_s7 + $0x20] sm:$0xff]   ;;  %v655_v36 = vld [vmem:[%s919_s7 + $0x18] sm:$0xff]  }
  0x2f   :  { %589 = vmatprep.subr.bf16.mxu0 %v728_v0  ;;  %v501_v37 = vld [vmem:[#allocation6] ss:$0 sm:$0xff]  ;;  %v656_v47 = vld [vmem:[%s919_s7 + $0x10] sm:$0xff]   ;;  %v658_v49 = vld [vmem:[%s919_s7] sm:$0xff]  }
  0x30   :  { %v657_v48 = vld [vmem:[%s919_s7 + $0x8] sm:$0xff]   ;;  %v510_v50 = vld [vmem:[%s918_s6] ss:$0 sm:$0xff] }
  0x31   :  { %572 = vmatpush3.bf16.msra.mxu1 %v637_v8  ;;  %v519_v60 = vld [vmem:[%s920_s8] ss:$0 sm:$0xff] }
  0x32   :  { %573 = vmatprep.subr.bf16.mxu1 %v728_v0  ;;  %590 = vmatpush3.bf16.msra.mxu0 %v644_v15 }
  0x33   :  { %591 = vmatprep.subr.bf16.mxu0 %v728_v0 }
  0x35   :  { %574 = vmatpush3.bf16.msra.mxu1 %v638_v9 }
  0x36   :  { %575 = vmatprep.subr.bf16.mxu1 %v728_v0  ;;  %592 = vmatpush3.bf16.msra.mxu0 %v645_v16 }
  0x37   :  { %593 = vmatprep.subr.bf16.mxu0 %v728_v0 }
  0x39   :  { %576 = vmatpush3.bf16.msra.mxu1 %v639_v10 }
  0x3a   :  { %577 = vmatprep.subr.bf16.mxu1 %v728_v0  ;;  %594 = vmatpush3.bf16.msra.mxu0 %v646_v17 }
  0x3b   :  { %595 = vmatprep.subr.bf16.mxu0 %v728_v0 }
  0x3d   :  { %578 = vmatpush3.bf16.msra.mxu1 %v640_v11 }
  0x3e   :  { %579 = vmatprep.subr.bf16.mxu1 %v728_v0  ;;  %596 = vmatpush3.bf16.msra.mxu0 %v647_v18 }
  0x3f   :  { %597 = vmatprep.subr.bf16.mxu0 %v728_v0 }
  0x41   :  { %580 = vmatpush3.bf16.msra.mxu1 %v641_v12 }
  0x42   :  { %581 = vmatprep.subr.bf16.mxu1 %v728_v0  ;;  %598 = vmatpush3.bf16.msra.mxu0 %v648_v29 }
  0x43   :  { %599 = vmatprep.subr.bf16.mxu0 %v728_v0 }
  0x45   :  { %582 = vmatpush3.bf16.msra.mxu1 %v642_v13 }
  0x46   :  { %607 = vmatprep.subr.bf16.mxu1 %v728_v0  ;;  %600 = vmatpush3.bf16.msra.mxu0 %v649_v30 }
  0x47   :  { %601 = vmatprep.subr.bf16.mxu0 %v728_v0 }
  0x4a   :  { %602 = vmatpush3.bf16.msra.mxu0 %v650_v31 }
  0xec   :  { %v129_v20 = vpop.f32.mrf.mxu0 }
  0xed   :  { %v130_v22 = vadd.f32 %v498_v19, %v129_v20 }
  0xee   :  { %v565_v21 = vpop.f32.mrf.mxu0 }
  0xef   :  { %v136_v26 = vmax.f32 %v130_v22, 0.0 }
  0xf0   :  { %v132_v23 = vpop.f32.mrf.mxu0 }
  0xf1   :  { %v133_v24 = vadd.f32 %v498_v19, %v132_v23 }
  0xf2   :  { %v566_v25 = vpop.f32.mrf.mxu0 }
  0xf3   :  { %v137_v27 = vmax.f32 %v133_v24, 0.0 }
  0xf5   :  { %v138_v28 = vpack.c.bf16 %v137_v27, %v136_v26 }
  0xf7   :  { %584 = vmatmul.mubr.bf16.vlgmr.msra.gmra.mxu1 %v138_v28 }
  0xf8   :  { %623 = vmatprep.mubr.msk.bf16.mxu1 %vm729_vm0, %v728_v0  ;;  %608 = vmatpush3.bf16.msra.mxu1 %v651_v32 }
  0xf9   :  { %609 = vmatprep.subr.bf16.mxu1 %v728_v0 }
  0xfc   :  { %610 = vmatpush3.bf16.msra.mxu1 %v652_v33 }
  0xfd   :  { %611 = vmatprep.subr.bf16.mxu1 %v728_v0 }
 0x100   :  { %612 = vmatpush3.bf16.msra.mxu1 %v653_v34 }
 0x101   :  { %613 = vmatprep.subr.bf16.mxu1 %v728_v0 }
 0x104   :  { %614 = vmatpush3.bf16.msra.mxu1 %v654_v35 }
 0x105   :  { %615 = vmatprep.subr.bf16.mxu1 %v728_v0 }
 0x108   :  { %616 = vmatpush3.bf16.msra.mxu1 %v655_v36 }
 0x109   :  { %617 = vmatprep.subr.bf16.mxu1 %v728_v0 }
 0x10c   :  { %618 = vmatpush3.bf16.msra.mxu1 %v656_v47 }
 0x10d   :  { %619 = vmatprep.subr.bf16.mxu1 %v728_v0 }
 0x110   :  { %620 = vmatpush3.bf16.msra.mxu1 %v657_v48 }
 0x111   :  { %621 = vmatprep.subr.bf16.mxu1 %v728_v0 }
 0x114   :  { %622 = vmatpush3.bf16.msra.mxu1 %v658_v49 }
 0x1b7   :  { %v244_v38 = vpop.f32.mrf.mxu1 }
 0x1b8   :  { %v245_v40 = vadd.f32 %v501_v37, %v244_v38 }
 0x1b9   :  { %v585_v39 = vpop.f32.mrf.mxu1 }
 0x1ba   :  { %v251_v44 = vmax.f32 %v245_v40, 0.0 }
 0x1bb   :  { %v247_v41 = vpop.f32.mrf.mxu1 }
 0x1bc   :  { %v248_v42 = vadd.f32 %v501_v37, %v247_v41 }
 0x1bd   :  { %v586_v43 = vpop.f32.mrf.mxu1 }
 0x1be   :  { %v252_v45 = vmax.f32 %v248_v42, 0.0 }
 0x1c0   :  { %v253_v46 = vpack.c.bf16 %v252_v45, %v251_v44 }
 0x1c2   :  { %604 = vmatmul.mubr.bf16.vlgmr.msra.gmra.mxu0 %v253_v46 }
 0x282   :  { %v359_v51 = vpop.f32.mrf.mxu0 }
 0x283   :  { %v360_v53 = vadd.f32 %v510_v50, %v359_v51 }
 0x284   :  { %v605_v52 = vpop.f32.mrf.mxu0 }
 0x285   :  { %v366_v57 = vmax.f32 %v360_v53, 0.0 }
 0x286   :  { %v362_v54 = vpop.f32.mrf.mxu0 }
 0x287   :  { %v363_v55 = vadd.f32 %v510_v50, %v362_v54 }
 0x288   :  { %v606_v56 = vpop.f32.mrf.mxu0 }
 0x289   :  { %v367_v58 = vmax.f32 %v363_v55, 0.0 }
 0x28b   :  { %v368_v59 = vpack.c.bf16 %v367_v58, %v366_v57 }
 0x28d   :  { %624 = vmatmul.mubr.bf16.vlgmr.msra.gmra.mxu1 %v368_v59 }
 0x34d   :  { %v474_v61 = vpop.f32.mrf.mxu1 }
 0x34e   :  { %v475_v62 = vadd.f32 %v519_v60, %v474_v61 }
 0x34f   :  { %v625_v63 = vpop.f32.mrf.mxu1 }
 0x350   :  { %v530_v0 = vpack.c.bf16 %v475_v62, %v475_v62 }
 0x351   :  { %v477_v1 = vpop.f32.mrf.mxu1 }
 0x352   :  { %490 = vst.msk [vmem:[%s921_s9] sm:$0xf] %vm489_vm3, %v530_v0  ;;  %v478_v2 = vadd.f32 %v519_v60, %v477_v1 }
 0x353   :  { %v626_v3 = vpop.f32.mrf.mxu1 }
 0x354   :  { %v531_v4 = vpack.c.bf16 %v478_v2, %v478_v2 }
 0x356   :  { %491 = vst.msk [vmem:[%s921_s9 + $0x4] sm:$0xf] %vm489_vm3, %v531_v4 }
 0x357   :  { %496 = vsyncpa [#allocation3], 1 }
 0x358   :  { %497 = vsyncpa [#allocation5], 1 }

</bundles_post_ra>
